<compile_context>
chip_gen: v5e
topology: v5e:2x2
jax: 0.10.0
libtpu: 0.0.40
codegen_flags: <defaults>
</compile_context>

<pallas_src>
import jax
import jax.numpy as jnp
from jax.experimental import pallas as pl
from jax.experimental.pallas import tpu as pltpu

D_IN, H1, H2, D_OUT = 784, 256, 64, 10


def _fused_mlp_kernel(x_ref, w1_ref, b1_ref, w2_ref, b2_ref, w3_ref, b3_ref, o_ref):
    """One (TM, 784) row-tile: fc1 -> relu -> fc2 -> relu -> fc3 -> relu -> log_softmax."""
    x = x_ref[...]                                                     # bf16 (TM, 784)

    h = jnp.dot(x, w1_ref[...], preferred_element_type=jnp.float32) + b1_ref[...]
    h = jnp.maximum(h, 0.0)                                            # f32 (TM, 256)

    h = jnp.dot(h.astype(jnp.bfloat16), w2_ref[...],
                preferred_element_type=jnp.float32) + b2_ref[...]
    h = jnp.maximum(h, 0.0)                                            # f32 (TM, 64)

    z = jnp.dot(h.astype(jnp.bfloat16), w3_ref[...],
                preferred_element_type=jnp.float32) + b3_ref[...]
    z = jnp.maximum(z, 0.0)                                            # f32 (TM, 10)

    # Numerically-stable log_softmax over the class axis (kept in f32).
    m = jnp.max(z, axis=-1, keepdims=True)
    lse = m + jnp.log(jnp.sum(jnp.exp(z - m), axis=-1, keepdims=True))
    o_ref[...] = (z - lse).astype(o_ref.dtype)


def _round_up(n, m):
    return ((n + m - 1) // m) * m


def _tile_rows(n, max_tile_m):
    """Row-tile size: multiple of 8 sublanes; >=2 grid steps once there is enough
    work so both v7x TensorCores get rows; capped so big batches still pipeline."""
    if n >= 16:
        tm = _round_up(pl.cdiv(n, 2), 8)
    else:
        tm = _round_up(n, 8)
    return min(tm, max_tile_m)


def feedforward(params, x, *, max_tile_m=1024):
    """x: (N, ...) with prod(trailing dims) == 784  ->  (N, 10) f32 log-probabilities."""
    n = x.shape[0]
    x = x.reshape(n, -1).astype(jnp.bfloat16)          # torch .view(N, -1), bf16 stream
    assert x.shape[1] == D_IN, f"expected {D_IN} input features, got {x.shape[1]}"

    tm = _tile_rows(n, max_tile_m)
    grid_m = pl.cdiv(n, tm)                            # no padding: tail tile is masked

    out = pl.pallas_call(
        _fused_mlp_kernel,
        out_shape=jax.ShapeDtypeStruct((n, D_OUT), jnp.float32),
        grid_spec=pltpu.PrefetchScalarGridSpec(
            num_scalar_prefetch=0,
            grid=(grid_m,),
            in_specs=[
                pl.BlockSpec((tm, D_IN), lambda i: (i, 0)),      # x row-tile (streamed)
                pl.BlockSpec((D_IN, H1), lambda i: (0, 0)),      # w1 (VMEM-resident)
                pl.BlockSpec((1, H1), lambda i: (0, 0)),         # b1
                pl.BlockSpec((H1, H2), lambda i: (0, 0)),        # w2
                pl.BlockSpec((1, H2), lambda i: (0, 0)),         # b2
                pl.BlockSpec((H2, D_OUT), lambda i: (0, 0)),     # w3
                pl.BlockSpec((1, D_OUT), lambda i: (0, 0)),      # b3
            ],
            out_specs=pl.BlockSpec((tm, D_OUT), lambda i: (i, 0)),
        ),
        compiler_params=pltpu.CompilerParams(
            dimension_semantics=("parallel",),
        ),
    )(x, params["w1"], params["b1"], params["w2"], params["b2"],
      params["w3"], params["b3"])

    return out


def init_params(key):
    """PyTorch nn.Linear-style init; weights PRE-TRANSPOSED to (in, out), stored bf16."""
    ks = jax.random.split(key, 6)

    def u(k, shape, fan_in):
        bound = 1.0 / jnp.sqrt(float(fan_in))
        return jax.random.uniform(k, shape, jnp.float32, -bound, bound).astype(jnp.bfloat16)

    return {
        "w1": u(ks[0], (D_IN, H1), D_IN),
        "b1": u(ks[1], (1, H1), D_IN),
        "w2": u(ks[2], (H1, H2), H1),
        "b2": u(ks[3], (1, H2), H1),
        "w3": u(ks[4], (H2, D_OUT), H2),
        "b3": u(ks[5], (1, D_OUT), H2),
    }


def _reference(params, x):
    """Pure-JAX reference (same params, f32 math) for correctness checking."""
    x = x.reshape(x.shape[0], -1).astype(jnp.float32)
    w1, b1 = params["w1"].astype(jnp.float32), params["b1"].astype(jnp.float32)
    w2, b2 = params["w2"].astype(jnp.float32), params["b2"].astype(jnp.float32)
    w3, b3 = params["w3"].astype(jnp.float32), params["b3"].astype(jnp.float32)
    h = jnp.maximum(x @ w1 + b1, 0.0)
    h = jnp.maximum(h @ w2 + b2, 0.0)
    z = jnp.maximum(h @ w3 + b3, 0.0)
    return jax.nn.log_softmax(z, axis=-1)


if __name__ == "__main__":
    key = jax.random.PRNGKey(0)
    pkey, xkey = jax.random.split(key)
    params = init_params(pkey)

    fwd = jax.jit(feedforward)

    # batch=2 exercises a single partial tile; batch=20 exercises a 2-step grid
    # with a masked (unaligned) tail tile — the no-pad path.
    for batch in (2, 20):
        x = jax.random.normal(xkey, (batch, 1, 28, 28), dtype=jnp.float32)
        out = jax.block_until_ready(fwd(params, x))

        assert out.shape == (batch, D_OUT), out.shape
        ref = _reference(params, x)
        max_err = float(jnp.max(jnp.abs(out - ref)))
        assert max_err < 0.08, f"max |out - ref| = {max_err}"
        # log_softmax sanity: per-row probabilities sum to 1, log-probs are <= 0
        probs_sum = jnp.sum(jnp.exp(out), axis=1)
        assert bool(jnp.all(jnp.abs(probs_sum - 1.0) < 1e-3)), probs_sum
        assert bool(jnp.all(out <= 1e-5)), out

    print("KERNEL_OK")
</pallas_src>

<mosaic_0001>
module attributes {stable_mosaic.version = 11 : i64} {
  func.func @_fused_mlp_kernel(%arg0: i32, %arg1: memref<8x784xbf16, #tpu.memory_space<vmem>>, %arg2: memref<784x256xbf16, #tpu.memory_space<vmem>>, %arg3: memref<1x256xbf16, #tpu.memory_space<vmem>>, %arg4: memref<256x64xbf16, #tpu.memory_space<vmem>>, %arg5: memref<1x64xbf16, #tpu.memory_space<vmem>>, %arg6: memref<64x10xbf16, #tpu.memory_space<vmem>>, %arg7: memref<1x10xbf16, #tpu.memory_space<vmem>>, %arg8: memref<8x10xf32, #tpu.memory_space<vmem>>) attributes {dimension_semantics = [#tpu.dimension_semantics<parallel>], iteration_bounds = array<i64: 1>, scalar_prefetch = 0 : i64, scratch_operands = 0 : i64, tpu.core_type = #tpu.core_type<tc>, window_params = [{transform_indices = @transform_0, window_bounds = array<i64: 8, 784>}, {pipeline_mode = #tpu.pipeline_mode<synchronous>, transform_indices = @transform_1, window_bounds = array<i64: 784, 256>}, {pipeline_mode = #tpu.pipeline_mode<synchronous>, transform_indices = @transform_2, window_bounds = array<i64: 1, 256>}, {pipeline_mode = #tpu.pipeline_mode<synchronous>, transform_indices = @transform_3, window_bounds = array<i64: 256, 64>}, {pipeline_mode = #tpu.pipeline_mode<synchronous>, transform_indices = @transform_4, window_bounds = array<i64: 1, 64>}, {pipeline_mode = #tpu.pipeline_mode<synchronous>, transform_indices = @transform_5, window_bounds = array<i64: 64, 10>}, {pipeline_mode = #tpu.pipeline_mode<synchronous>, transform_indices = @transform_6, window_bounds = array<i64: 1, 10>}, {transform_indices = @transform_7, window_bounds = array<i64: 8, 10>}]} {
    %c0 = arith.constant 0 : index
    %c0_0 = arith.constant 0 : index
    %0 = vector.load %arg1[%c0, %c0_0] : memref<8x784xbf16, #tpu.memory_space<vmem>>, vector<8x784xbf16>
    %c0_1 = arith.constant 0 : index
    %c0_2 = arith.constant 0 : index
    %1 = vector.load %arg2[%c0_1, %c0_2] : memref<784x256xbf16, #tpu.memory_space<vmem>>, vector<784x256xbf16>
    %cst = arith.constant dense<0.000000e+00> : vector<8x256xf32>
    %2 = tpu.matmul %0, %1, %cst {dimension_numbers = #tpu.dot_dimension_numbers<[1], [0], [0], [1], [0, 0, 1, 1], [], []>} : vector<8x784xbf16>, vector<784x256xbf16>, vector<8x256xf32> -> vector<8x256xf32>
    %c0_3 = arith.constant 0 : index
    %c0_4 = arith.constant 0 : index
    %3 = vector.load %arg3[%c0_3, %c0_4] : memref<1x256xbf16, #tpu.memory_space<vmem>>, vector<1x256xbf16>
    %4 = arith.extf %3 : vector<1x256xbf16> to vector<1x256xf32>
    %5 = vector.broadcast %4 : vector<1x256xf32> to vector<8x256xf32>
    %6 = arith.addf %2, %5 : vector<8x256xf32>
    %cst_5 = arith.constant 0.000000e+00 : f32
    %7 = vector.broadcast %cst_5 : f32 to vector<8x256xf32>
    %8 = arith.maximumf %6, %7 : vector<8x256xf32>
    %9 = arith.truncf %8 : vector<8x256xf32> to vector<8x256xbf16>
    %c0_6 = arith.constant 0 : index
    %c0_7 = arith.constant 0 : index
    %10 = vector.load %arg4[%c0_6, %c0_7] : memref<256x64xbf16, #tpu.memory_space<vmem>>, vector<256x64xbf16>
    %cst_8 = arith.constant dense<0.000000e+00> : vector<8x64xf32>
    %11 = tpu.matmul %9, %10, %cst_8 {dimension_numbers = #tpu.dot_dimension_numbers<[1], [0], [0], [1], [0, 0, 1, 1], [], []>} : vector<8x256xbf16>, vector<256x64xbf16>, vector<8x64xf32> -> vector<8x64xf32>
    %c0_9 = arith.constant 0 : index
    %c0_10 = arith.constant 0 : index
    %12 = vector.load %arg5[%c0_9, %c0_10] : memref<1x64xbf16, #tpu.memory_space<vmem>>, vector<1x64xbf16>
    %13 = arith.extf %12 : vector<1x64xbf16> to vector<1x64xf32>
    %14 = vector.broadcast %13 : vector<1x64xf32> to vector<8x64xf32>
    %15 = arith.addf %11, %14 : vector<8x64xf32>
    %cst_11 = arith.constant 0.000000e+00 : f32
    %16 = vector.broadcast %cst_11 : f32 to vector<8x64xf32>
    %17 = arith.maximumf %15, %16 : vector<8x64xf32>
    %18 = arith.truncf %17 : vector<8x64xf32> to vector<8x64xbf16>
    %c0_12 = arith.constant 0 : index
    %c0_13 = arith.constant 0 : index
    %19 = vector.load %arg6[%c0_12, %c0_13] : memref<64x10xbf16, #tpu.memory_space<vmem>>, vector<64x10xbf16>
    %cst_14 = arith.constant dense<0.000000e+00> : vector<8x10xf32>
    %20 = tpu.matmul %18, %19, %cst_14 {dimension_numbers = #tpu.dot_dimension_numbers<[1], [0], [0], [1], [0, 0, 1, 1], [], []>} : vector<8x64xbf16>, vector<64x10xbf16>, vector<8x10xf32> -> vector<8x10xf32>
    %c0_15 = arith.constant 0 : index
    %c0_16 = arith.constant 0 : index
    %21 = vector.load %arg7[%c0_15, %c0_16] : memref<1x10xbf16, #tpu.memory_space<vmem>>, vector<1x10xbf16>
    %22 = arith.extf %21 : vector<1x10xbf16> to vector<1x10xf32>
    %23 = vector.broadcast %22 : vector<1x10xf32> to vector<8x10xf32>
    %24 = arith.addf %20, %23 : vector<8x10xf32>
    %cst_17 = arith.constant 0.000000e+00 : f32
    %25 = vector.broadcast %cst_17 : f32 to vector<8x10xf32>
    %26 = arith.maximumf %24, %25 : vector<8x10xf32>
    %cst_18 = arith.constant dense<0xFF800000> : vector<8xf32>
    %27 = vector.multi_reduction <maximumf>, %26, %cst_18 [1] : vector<8x10xf32> to vector<8xf32>
    %28 = vector.shape_cast %27 : vector<8xf32> to vector<8x1xf32>
    %29 = vector.broadcast %28 : vector<8x1xf32> to vector<8x10xf32>
    %30 = arith.subf %26, %29 : vector<8x10xf32>
    %31 = math.exp %30 : vector<8x10xf32>
    %cst_19 = arith.constant dense<0.000000e+00> : vector<8xf32>
    %32 = vector.multi_reduction <add>, %31, %cst_19 [1] : vector<8x10xf32> to vector<8xf32>
    %33 = vector.shape_cast %32 : vector<8xf32> to vector<8x1xf32>
    %34 = math.log %33 : vector<8x1xf32>
    %35 = arith.addf %28, %34 : vector<8x1xf32>
    %36 = vector.broadcast %35 : vector<8x1xf32> to vector<8x10xf32>
    %37 = arith.subf %26, %36 : vector<8x10xf32>
    %c0_20 = arith.constant 0 : index
    %c0_21 = arith.constant 0 : index
    %38 = vector.load %arg8[%c0_20, %c0_21] : memref<8x10xf32, #tpu.memory_space<vmem>>, vector<8x10xf32>
    tpu.vector_store %arg8[%c0_20, %c0_21], %37 {strides = array<i32>} : memref<8x10xf32, #tpu.memory_space<vmem>>, vector<8x10xf32>,
    return
  }
  func.func @transform_0(%arg0: i32) -> (i32, i32) {
    %c0_i32 = arith.constant 0 : i32
    %c0_i32_0 = arith.constant 0 : i32
    return %arg0, %c0_i32 : i32, i32
  }
  func.func @transform_1(%arg0: i32) -> (i32, i32) {
    %c0_i32 = arith.constant 0 : i32
    %c0_i32_0 = arith.constant 0 : i32
    %c0_i32_1 = arith.constant 0 : i32
    return %c0_i32, %c0_i32_0 : i32, i32
  }
  func.func @transform_2(%arg0: i32) -> (i32, i32) {
    %c0_i32 = arith.constant 0 : i32
    %c0_i32_0 = arith.constant 0 : i32
    %c0_i32_1 = arith.constant 0 : i32
    return %c0_i32, %c0_i32_0 : i32, i32
  }
  func.func @transform_3(%arg0: i32) -> (i32, i32) {
    %c0_i32 = arith.constant 0 : i32
    %c0_i32_0 = arith.constant 0 : i32
    %c0_i32_1 = arith.constant 0 : i32
    return %c0_i32, %c0_i32_0 : i32, i32
  }
  func.func @transform_4(%arg0: i32) -> (i32, i32) {
    %c0_i32 = arith.constant 0 : i32
    %c0_i32_0 = arith.constant 0 : i32
    %c0_i32_1 = arith.constant 0 : i32
    return %c0_i32, %c0_i32_0 : i32, i32
  }
  func.func @transform_5(%arg0: i32) -> (i32, i32) {
    %c0_i32 = arith.constant 0 : i32
    %c0_i32_0 = arith.constant 0 : i32
    %c0_i32_1 = arith.constant 0 : i32
    return %c0_i32, %c0_i32_0 : i32, i32
  }
  func.func @transform_6(%arg0: i32) -> (i32, i32) {
    %c0_i32 = arith.constant 0 : i32
    %c0_i32_0 = arith.constant 0 : i32
    %c0_i32_1 = arith.constant 0 : i32
    return %c0_i32, %c0_i32_0 : i32, i32
  }
  func.func @transform_7(%arg0: i32) -> (i32, i32) {
    %c0_i32 = arith.constant 0 : i32
    %c0_i32_0 = arith.constant 0 : i32
    return %arg0, %c0_i32 : i32, i32
  }
}

</mosaic_0001>

<bundles_post_ra>
// kernel: feedforward.1
= control target key start
LH: loop header
LB: loop body
LE: loop exit
PB: predicated region body
PF: predicated region fallthrough
CT: control target
= control target key end

     0   :  { %12 = vsyncpa [#allocation3], 0  ;;  %s1925_s0 = inlined_call_operand.vmem [shape: bf16[2,784], index: 0, kind: input, shape index: {}]   ;;  %s1926_s1 = inlined_call_operand.hbm [shape: bf16[784,256], index: 1, kind: input, shape index: {}]   ;;  %s1927_s2 = inlined_call_operand.vmem [shape: bf16[1,256], index: 2, kind: input, shape index: {}]   ;;  %s1928_s3 = inlined_call_operand.vmem [shape: bf16[256,64], index: 3, kind: input, shape index: {}]   ;;  %s1929_s4 = inlined_call_operand.vmem [shape: bf16[1,64], index: 4, kind: input, shape index: {}]   ;;  %s1930_s5 = inlined_call_operand.vmem [shape: bf16[64,10], index: 5, kind: input, shape index: {}]   ;;  %s1931_s6 = inlined_call_operand.vmem [shape: bf16[1,10], index: 6, kind: input, shape index: {}]   ;;  %s1932_s7 = inlined_call_operand.hbm [shape: f32[2,10], index: 7, kind: output, shape index: {}]  }
   0x1   :  { %13 = vsyncpa [#allocation4], 0  ;;  %s20_s26 = sshll.u32 %s1926_s1, 4  ;;  %s1759_s27 = smov [#allocation2]   ;;  %s21_s26 = int_to_ptr.hbm [resolvable:$true] %s20_s26 }
   0x2   :  { %s22_s28 = sshll.u32 %s1759_s27, 4  ;;  %s1760_s29 = smov 128   ;;  %s23_s28 = int_to_ptr.vmem [resolvable:$true] %s22_s28 }
   0x3   :  { %s1761_s30 = smov 8  }
   0x4   :  { %28 = dma.hbm_to_vmem [thread:$0]  %s21_s26, 12544, %s23_s28, [#allocation3], %s1760_s29, %s1760_s29, %s1761_s30  }
   0x5   :  { %1755 = dma.done.wait [#allocation3], 12544  }
   0x6   :  { %1756 = vsyncadd [#allocation3], 4294954752  ;;  %v1162_v0 = vld [vmem:[#allocation2 + $0x70] sm:$0xf]  ;;  %v1594_v1 = vld [vmem:[#allocation2 + $0x74] sm:$0xf0] }
   0x7   :  { %v1290_v2 = vld [vmem:[#allocation2 + $0x170] sm:$0xf]  ;;  %v1163_v3 = vor.u32 %v1594_v1, %v1162_v0  ;;  %v1626_v4 = vld [vmem:[#allocation2 + $0x174] sm:$0xf0]  ;;  %v1154_v11 = vld [vmem:[#allocation2 + $0x60] sm:$0xf] }
   0x8   :  { %v1354_v5 = vld [vmem:[#allocation2 + $0x1f0] sm:$0xf]  ;;  %v1642_v6 = vld [vmem:[#allocation2 + $0x1f4] sm:$0xf0]  ;;  %v1291_v7 = vor.u32 %v1626_v4, %v1290_v2  ;;  %v1592_v13 = vld [vmem:[#allocation2 + $0x64] sm:$0xf0] }
   0x9   :  { %v1355_v8 = vor.u32 %v1642_v6, %v1354_v5  ;;  %v1226_v9 = vld [vmem:[#allocation2 + $0xf0] sm:$0xf]  ;;  %v1610_v10 = vld [vmem:[#allocation2 + $0xf4] sm:$0xf0]  ;;  %672 = vmatpush.bf16.msra.mxu0 %v1163_v3  ;;  %v1282_v14 = vld [vmem:[#allocation2 + $0x160] sm:$0xf]  ;;  %v1155_v16 = vor.u32 %v1592_v13, %v1154_v11 }
   0xa   :  { %v1227_v12 = vor.u32 %v1610_v10, %v1226_v9  ;;  %v1624_v15 = vld [vmem:[#allocation2 + $0x164] sm:$0xf0]  ;;  %698 = vmatpush.bf16.msra.mxu2 %v1291_v7  ;;  %v1346_v18 = vld [vmem:[#allocation2 + $0x1e0] sm:$0xf]  ;;  %v1146_v23 = vld [vmem:[#allocation2 + $0x50] sm:$0xf] }
   0xb   :  { %711 = vmatpush.bf16.msra.mxu3 %v1355_v8  ;;  %v1283_v17 = vor.u32 %v1624_v15, %v1282_v14  ;;  %v1640_v19 = vld [vmem:[#allocation2 + $0x1e4] sm:$0xf0]  ;;  %v1218_v20 = vld [vmem:[#allocation2 + $0xe0] sm:$0xf]  ;;  %v1590_v24 = vld [vmem:[#allocation2 + $0x54] sm:$0xf0] }
   0xc   :  { %685 = vmatpush.bf16.msra.mxu1 %v1227_v12  ;;  %v1347_v21 = vor.u32 %v1640_v19, %v1346_v18  ;;  %v1608_v22 = vld [vmem:[#allocation2 + $0xe4] sm:$0xf0]  ;;  %v1274_v26 = vld [vmem:[#allocation2 + $0x150] sm:$0xf]  ;;  %v1622_v27 = vld [vmem:[#allocation2 + $0x154] sm:$0xf0]  ;;  %v1147_v29 = vor.u32 %v1590_v24, %v1146_v23 }
   0xd   :  { %v1219_v25 = vor.u32 %v1608_v22, %v1218_v20  ;;  %v1338_v28 = vld [vmem:[#allocation2 + $0x1d0] sm:$0xf]  ;;  %673 = vmatpush.bf16.msra.mxu0 %v1155_v16  ;;  %v1638_v30 = vld [vmem:[#allocation2 + $0x1d4] sm:$0xf0]  ;;  %v1275_v33 = vor.u32 %v1622_v27, %v1274_v26  ;;  %v1138_v35 = vld [vmem:[#allocation2 + $0x40] sm:$0xf] }
   0xe   :  { %v1210_v31 = vld [vmem:[#allocation2 + $0xd0] sm:$0xf]  ;;  %v1606_v32 = vld [vmem:[#allocation2 + $0xd4] sm:$0xf0]  ;;  %699 = vmatpush.bf16.msra.mxu2 %v1283_v17  ;;  %v1339_v34 = vor.u32 %v1638_v30, %v1338_v28  ;;  %v1588_v36 = vld [vmem:[#allocation2 + $0x44] sm:$0xf0] }
   0xf   :  { %712 = vmatpush.bf16.msra.mxu3 %v1347_v21  ;;  %v1266_v37 = vld [vmem:[#allocation2 + $0x140] sm:$0xf]  ;;  %v1211_v38 = vor.u32 %v1606_v32, %v1210_v31  ;;  %v1620_v39 = vld [vmem:[#allocation2 + $0x144] sm:$0xf0]  ;;  %v1139_v44 = vor.u32 %v1588_v36, %v1138_v35  ;;  %v1130_v47 = vld [vmem:[#allocation2 + $0x30] sm:$0xf] }
  0x10   :  { %686 = vmatpush.bf16.msra.mxu1 %v1219_v25  ;;  %v1330_v40 = vld [vmem:[#allocation2 + $0x1c0] sm:$0xf]  ;;  %v1636_v41 = vld [vmem:[#allocation2 + $0x1c4] sm:$0xf0]  ;;  %v1267_v45 = vor.u32 %v1620_v39, %v1266_v37  ;;  %v1586_v48 = vld [vmem:[#allocation2 + $0x34] sm:$0xf0] }
  0x11   :  { %v1202_v42 = vld [vmem:[#allocation2 + $0xc0] sm:$0xf]  ;;  %v1604_v43 = vld [vmem:[#allocation2 + $0xc4] sm:$0xf0]  ;;  %674 = vmatpush.bf16.msra.mxu0 %v1147_v29  ;;  %v1331_v46 = vor.u32 %v1636_v41, %v1330_v40  ;;  %v1258_v49 = vld [vmem:[#allocation2 + $0x130] sm:$0xf]  ;;  %v1131_v56 = vor.u32 %v1586_v48, %v1130_v47 }
  0x12   :  { %700 = vmatpush.bf16.msra.mxu2 %v1275_v33  ;;  %v1203_v50 = vor.u32 %v1604_v43, %v1202_v42  ;;  %v1618_v51 = vld [vmem:[#allocation2 + $0x134] sm:$0xf0]  ;;  %v1322_v52 = vld [vmem:[#allocation2 + $0x1b0] sm:$0xf]  ;;  %v1122_v59 = vld [vmem:[#allocation2 + $0x20] sm:$0xf] }
  0x13   :  { %713 = vmatpush.bf16.msra.mxu3 %v1339_v34  ;;  %v1634_v53 = vld [vmem:[#allocation2 + $0x1b4] sm:$0xf0]  ;;  %v1194_v54 = vld [vmem:[#allocation2 + $0xb0] sm:$0xf]  ;;  %v1259_v57 = vor.u32 %v1618_v51, %v1258_v49  ;;  %v1584_v60 = vld [vmem:[#allocation2 + $0x24] sm:$0xf0] }
  0x14   :  { %687 = vmatpush.bf16.msra.mxu1 %v1211_v38  ;;  %v1602_v55 = vld [vmem:[#allocation2 + $0xb4] sm:$0xf0]  ;;  %v1323_v58 = vor.u32 %v1634_v53, %v1322_v52  ;;  %v1250_v61 = vld [vmem:[#allocation2 + $0x120] sm:$0xf]  ;;  %v1616_v63 = vld [vmem:[#allocation2 + $0x124] sm:$0xf0]  ;;  %v1123_v4 = vor.u32 %v1584_v60, %v1122_v59 }
  0x15   :  { %675 = vmatpush.bf16.msra.mxu0 %v1139_v44  ;;  %v1195_v62 = vor.u32 %v1602_v55, %v1194_v54  ;;  %v1314_v0 = vld [vmem:[#allocation2 + $0x1a0] sm:$0xf]  ;;  %v1632_v1 = vld [vmem:[#allocation2 + $0x1a4] sm:$0xf0]  ;;  %v1114_v5 = vld [vmem:[#allocation2 + $0x10] sm:$0xf]  ;;  %v1251_v7 = vor.u32 %v1616_v63, %v1250_v61 }
  0x16   :  { %701 = vmatpush.bf16.msra.mxu2 %v1267_v45  ;;  %v1186_v2 = vld [vmem:[#allocation2 + $0xa0] sm:$0xf]  ;;  %v1600_v3 = vld [vmem:[#allocation2 + $0xa4] sm:$0xf0]  ;;  %v1582_v6 = vld [vmem:[#allocation2 + $0x14] sm:$0xf0]  ;;  %v1315_v8 = vor.u32 %v1632_v1, %v1314_v0 }
  0x17   :  { %714 = vmatpush.bf16.msra.mxu3 %v1331_v46  ;;  %v1242_v9 = vld [vmem:[#allocation2 + $0x110] sm:$0xf]  ;;  %v1614_v10 = vld [vmem:[#allocation2 + $0x114] sm:$0xf0]  ;;  %v1187_v12 = vor.u32 %v1600_v3, %v1186_v2  ;;  %v1106_v16 = vld [vmem:[#allocation2] sm:$0xf]  ;;  %v1115_v19 = vor.u32 %v1582_v6, %v1114_v5 }
  0x18   :  { %688 = vmatpush.bf16.msra.mxu1 %v1203_v50  ;;  %v1306_v11 = vld [vmem:[#allocation2 + $0x190] sm:$0xf]  ;;  %v1630_v13 = vld [vmem:[#allocation2 + $0x194] sm:$0xf0]  ;;  %v1580_v17 = vld [vmem:[#allocation2 + $0x4] sm:$0xf0]  ;;  %v1243_v26 = vor.u32 %v1614_v10, %v1242_v9 }
  0x19   :  { %676 = vmatpush.bf16.msra.mxu0 %v1131_v56  ;;  %v1178_v14 = vld [vmem:[#allocation2 + $0x90] sm:$0xf]  ;;  %v1598_v15 = vld [vmem:[#allocation2 + $0x94] sm:$0xf0]  ;;  %v1234_v20 = vld [vmem:[#allocation2 + $0x100] sm:$0xf]  ;;  %v1307_v27 = vor.u32 %v1630_v13, %v1306_v11  ;;  %v1107_v36 = vor.u32 %v1580_v17, %v1106_v16 }
  0x1a   :  { %702 = vmatpush.bf16.msra.mxu2 %v1259_v57  ;;  %v44_v18 = vld [vmem:[%s1925_s0] sm:$0x7f]  ;;  %v1612_v21 = vld [vmem:[#allocation2 + $0x104] sm:$0xf0]  ;;  %v1298_v22 = vld [vmem:[#allocation2 + $0x180] sm:$0xf]  ;;  %v1179_v31 = vor.u32 %v1598_v15, %v1178_v14 }
  0x1b   :  { %715 = vmatpush.bf16.msra.mxu3 %v1323_v58  ;;  %v1628_v23 = vld [vmem:[#allocation2 + $0x184] sm:$0xf0]  ;;  %v45_v24 = vld [vmem:[%s1925_s0 + $0x7] sm:$0x7f]  ;;  %v1418_v28 = vld [vmem:[#allocation2 + $0x270] sm:$0xf]  ;;  %v1235_v39 = vor.u32 %v1612_v21, %v1234_v20 }
  0x1c   :  { %689 = vmatpush.bf16.msra.mxu1 %v1195_v62  ;;  %v46_v25 = vld [vmem:[%s1925_s0 + $0xe] sm:$0x7f]  ;;  %v1658_v29 = vld [vmem:[#allocation2 + $0x274] sm:$0xf0]  ;;  %v47_v30 = vld [vmem:[%s1925_s0 + $0x15] sm:$0x7f]  ;;  %v1299_v40 = vor.u32 %v1628_v23, %v1298_v22 }
  0x1d   :  { %677 = vmatpush.bf16.msra.mxu0 %v1123_v4  ;;  %156 = vst [vmem:[#allocation1] ss:$9 sm:$0xff] %v44_v18  ;;  %v1593_v32 = vld [vmem:[#allocation2 + $0x74] sm:$0xf]  ;;  %v1164_v33 = vld [vmem:[#allocation2 + $0x78] sm:$0xf0]  ;;  %v1419_v43 = vor.u32 %v1658_v29, %v1418_v28 }
  0x1e   :  { %703 = vmatpush.bf16.msra.mxu2 %v1251_v7  ;;  %159 = vst [vmem:[#allocation1 + $0x1] ss:$9 sm:$0xff] %v45_v24  ;;  %v1170_v34 = vld [vmem:[#allocation2 + $0x80] sm:$0xf]  ;;  %v1596_v35 = vld [vmem:[#allocation2 + $0x84] sm:$0xf0]  ;;  %v1167_v44 = vor.u32 %v1593_v32, %v1164_v33 }
  0x1f   :  { %716 = vmatpush.bf16.msra.mxu3 %v1315_v8  ;;  %162 = vst [vmem:[#allocation1 + $0x2] ss:$9 sm:$0xff] %v46_v25  ;;  %v1490_v37 = vld [vmem:[#allocation2 + $0x300] sm:$0xf]  ;;  %v1676_v38 = vld [vmem:[#allocation2 + $0x304] sm:$0xf0]  ;;  %v1171_v48 = vor.u32 %v1596_v35, %v1170_v34 }
  0x20   :  { %690 = vmatpush.bf16.msra.mxu1 %v1187_v12  ;;  %165 = vst [vmem:[#allocation1 + $0x3] ss:$9 sm:$0xff] %v47_v30  ;;  %v1482_v41 = vld [vmem:[#allocation2 + $0x2f0] sm:$0xf]  ;;  %v1674_v42 = vld [vmem:[#allocation2 + $0x2f4] sm:$0xf0]  ;;  %v1491_v49 = vor.u32 %v1676_v38, %v1490_v37 }
  0x21   :  { %678 = vmatpush.bf16.msra.mxu0 %v1115_v19  ;;  %v1609_v45 = vld [vmem:[#allocation2 + $0xf4] sm:$0xf]  ;;  %v1228_v46 = vld [vmem:[#allocation2 + $0xf8] sm:$0xf0]  ;;  %v1410_v47 = vld [vmem:[#allocation2 + $0x260] sm:$0xf]  ;;  %v1483_v53 = vor.u32 %v1674_v42, %v1482_v41 }
  0x22   :  { %704 = vmatpush.bf16.msra.mxu2 %v1243_v26  ;;  %v1656_v50 = vld [vmem:[#allocation2 + $0x264] sm:$0xf0]  ;;  %v1591_v51 = vld [vmem:[#allocation2 + $0x64] sm:$0xf]  ;;  %v1156_v52 = vld [vmem:[#allocation2 + $0x68] sm:$0xf0]  ;;  %v1231_v55 = vor.u32 %v1609_v45, %v1228_v46 }
  0x23   :  { %717 = vmatpush.bf16.msra.mxu3 %v1307_v27  ;;  %v1474_v54 = vld [vmem:[#allocation2 + $0x2e0] sm:$0xf]  ;;  %v1672_v56 = vld [vmem:[#allocation2 + $0x2e4] sm:$0xf0]  ;;  %v1607_v57 = vld [vmem:[#allocation2 + $0xe4] sm:$0xf]  ;;  %v1411_v59 = vor.u32 %v1656_v50, %v1410_v47  ;;  %v1159_v60 = vor.u32 %v1591_v51, %v1156_v52 }
  0x24   :  { %691 = vmatpush.bf16.msra.mxu1 %v1179_v31  ;;  %v1220_v58 = vld [vmem:[#allocation2 + $0xe8] sm:$0xf0]  ;;  %v1402_v61 = vld [vmem:[#allocation2 + $0x250] sm:$0xf]  ;;  %v1654_v62 = vld [vmem:[#allocation2 + $0x254] sm:$0xf0]  ;;  %v1475_v3 = vor.u32 %v1672_v56, %v1474_v54 }
  0x25   :  { %679 = vmatpush.bf16.msra.mxu0 %v1107_v36  ;;  %v1589_v63 = vld [vmem:[#allocation2 + $0x54] sm:$0xf]  ;;  %v1148_v1 = vld [vmem:[#allocation2 + $0x58] sm:$0xf0]  ;;  %v1223_v6 = vor.u32 %v1607_v57, %v1220_v58  ;;  %v1466_v7 = vld [vmem:[#allocation2 + $0x2d0] sm:$0xf]  ;;  %v1403_v9 = vor.u32 %v1654_v62, %v1402_v61 }
  0x26   :  { %705 = vmatpush.bf16.msra.mxu2 %v1235_v39  ;;  %v1670_v8 = vld [vmem:[#allocation2 + $0x2d4] sm:$0xf0]  ;;  %v1151_v10 = vor.u32 %v1589_v63, %v1148_v1  ;;  %v1605_v11 = vld [vmem:[#allocation2 + $0xd4] sm:$0xf]  ;;  %v1212_v12 = vld [vmem:[#allocation2 + $0xd8] sm:$0xf0] }
  0x27   :  { %718 = vmatpush.bf16.msra.mxu3 %v1299_v40  ;;  %v1820_v0 = vld [vmem:[#allocation1 + $0x12] sm:$0xff]  ;;  %v1822_v2 = vld [vmem:[#allocation1] sm:$0xff]  ;;  %v1827_v5 = vld [vmem:[#allocation1 + $0x9] sm:$0xff]  ;;  %v1467_v17 = vor.u32 %v1670_v8, %v1466_v7  ;;  %v1215_v18 = vor.u32 %v1605_v11, %v1212_v12  ;;  %vm669_vm0 = vcmask 130048   ;;  %vm1052_vm1 = vcmask 523264  }
  0x28   :  { %692 = vmatpush.bf16.msra.mxu1 %v1171_v48  ;;  %v1825_v4 = vld [vmem:[#allocation1 + $0x1b] sm:$0xff]  ;;  %680 = vmatmul.bf16.vlgmr.msra.gmra.mxu0 %v1822_v2  ;;  %v1394_v13 = vld [vmem:[#allocation2 + $0x240] sm:$0xf]  ;;  %v1652_v14 = vld [vmem:[#allocation2 + $0x244] sm:$0xf0]  ;;  %vm1070_vm2 = vcmask 80896  }
  0x29   :  { %724 = vmatpush.bf16.msrb.mxu0 %v1419_v43  ;;  %706 = vmatmul.bf16.vlgmr.msra.gmra.mxu2 %v1820_v0  ;;  %v1587_v15 = vld [vmem:[#allocation2 + $0x44] sm:$0xf]  ;;  %v1140_v16 = vld [vmem:[#allocation2 + $0x48] sm:$0xf0]  ;;  %v1458_v19 = vld [vmem:[#allocation2 + $0x2c0] sm:$0xf]  ;;  %v1395_v21 = vor.u32 %v1652_v14, %v1394_v13 }
  0x2a   :  { %757 = vmatpush.bf16.msrb.mxu2 %v1491_v49  ;;  %719 = vmatmul.bf16.vlgmr.msra.gmra.mxu3 %v1825_v4  ;;  %v1668_v20 = vld [vmem:[#allocation2 + $0x2c4] sm:$0xf0]  ;;  %v1143_v22 = vor.u32 %v1587_v15, %v1140_v16  ;;  %v1603_v23 = vld [vmem:[#allocation2 + $0xc4] sm:$0xf]  ;;  %v1204_v24 = vld [vmem:[#allocation2 + $0xc8] sm:$0xf0] }
  0x2b   :  { %763 = vmatpush.bf16.msrb.mxu3 %v1167_v44  ;;  %693 = vmatmul.bf16.vlgmr.msra.gmra.mxu1 %v1827_v5  ;;  %v1386_v25 = vld [vmem:[#allocation2 + $0x230] sm:$0xf]  ;;  %v1650_v26 = vld [vmem:[#allocation2 + $0x234] sm:$0xf0]  ;;  %v1585_v27 = vld [vmem:[#allocation2 + $0x34] sm:$0xf]  ;;  %v1459_v29 = vor.u32 %v1668_v20, %v1458_v19  ;;  %v1207_v30 = vor.u32 %v1603_v23, %v1204_v24 }
  0x2c   :  { %737 = vmatpush.bf16.msrb.mxu1 %v1483_v53  ;;  %v1132_v28 = vld [vmem:[#allocation2 + $0x38] sm:$0xf0]  ;;  %v1450_v31 = vld [vmem:[#allocation2 + $0x2b0] sm:$0xf]  ;;  %v1666_v32 = vld [vmem:[#allocation2 + $0x2b4] sm:$0xf0]  ;;  %v1387_v33 = vor.u32 %v1650_v26, %v1386_v25 }
  0x2d   :  { %725 = vmatpush.bf16.msrb.mxu0 %v1411_v59  ;;  %v1135_v34 = vor.u32 %v1585_v27, %v1132_v28  ;;  %v1601_v35 = vld [vmem:[#allocation2 + $0xb4] sm:$0xf]  ;;  %v1196_v36 = vld [vmem:[#allocation2 + $0xb8] sm:$0xf0]  ;;  %v1378_v37 = vld [vmem:[#allocation2 + $0x220] sm:$0xf]  ;;  %v1451_v41 = vor.u32 %v1666_v32, %v1450_v31 }
  0x2e   :  { %776 = vmatpush.bf16.msra.mxu2 %v1231_v55  ;;  %v1648_v38 = vld [vmem:[#allocation2 + $0x224] sm:$0xf0]  ;;  %v1583_v39 = vld [vmem:[#allocation2 + $0x24] sm:$0xf]  ;;  %v1124_v40 = vld [vmem:[#allocation2 + $0x28] sm:$0xf0]  ;;  %v1199_v42 = vor.u32 %v1601_v35, %v1196_v36 }
  0x2f   :  { %764 = vmatpush.bf16.msrb.mxu3 %v1159_v60  ;;  %v1442_v43 = vld [vmem:[#allocation2 + $0x2a0] sm:$0xf]  ;;  %v1664_v44 = vld [vmem:[#allocation2 + $0x2a4] sm:$0xf0]  ;;  %v1832_v45 = vld [vmem:[#allocation1 + $0x36] sm:$0xff]  ;;  %v1379_v46 = vor.u32 %v1648_v38, %v1378_v37  ;;  %v1127_v47 = vor.u32 %v1583_v39, %v1124_v40 }
  0x30   :  { %738 = vmatpush.bf16.msrb.mxu1 %v1475_v3  ;;  %v1599_v48 = vld [vmem:[#allocation2 + $0xa4] sm:$0xf]  ;;  %v1188_v49 = vld [vmem:[#allocation2 + $0xa8] sm:$0xf0]  ;;  %v1370_v50 = vld [vmem:[#allocation2 + $0x210] sm:$0xf]  ;;  %v1443_v54 = vor.u32 %v1664_v44, %v1442_v43 }
  0x31   :  { %726 = vmatpush.bf16.msrb.mxu0 %v1403_v9  ;;  %v1646_v51 = vld [vmem:[#allocation2 + $0x214] sm:$0xf0]  ;;  %v1581_v52 = vld [vmem:[#allocation2 + $0x14] sm:$0xf]  ;;  %v1116_v53 = vld [vmem:[#allocation2 + $0x18] sm:$0xf0]  ;;  %v1191_v55 = vor.u32 %v1599_v48, %v1188_v49 }
  0x32   :  { %777 = vmatpush.bf16.msra.mxu2 %v1223_v6  ;;  %v1434_v56 = vld [vmem:[#allocation2 + $0x290] sm:$0xf]  ;;  %v1662_v57 = vld [vmem:[#allocation2 + $0x294] sm:$0xf0]  ;;  %v1597_v58 = vld [vmem:[#allocation2 + $0x94] sm:$0xf]  ;;  %v1371_v59 = vor.u32 %v1646_v51, %v1370_v50  ;;  %v1119_v60 = vor.u32 %v1581_v52, %v1116_v53 }
  0x33   :  { %765 = vmatpush.bf16.msrb.mxu3 %v1151_v10  ;;  %v1180_v61 = vld [vmem:[#allocation2 + $0x98] sm:$0xf0]  ;;  %v1362_v62 = vld [vmem:[#allocation2 + $0x200] sm:$0xf]  ;;  %v1644_v63 = vld [vmem:[#allocation2 + $0x204] sm:$0xf0]  ;;  %v1435_v7 = vor.u32 %v1662_v57, %v1434_v56 }
  0x34   :  { %739 = vmatpush.bf16.msrb.mxu1 %v1467_v17  ;;  %v1579_v1 = vld [vmem:[#allocation2 + $0x4] sm:$0xf]  ;;  %v1108_v3 = vld [vmem:[#allocation2 + $0x8] sm:$0xf0]  ;;  %v1625_v6 = vld [vmem:[#allocation2 + $0x174] sm:$0xf]  ;;  %v1183_v11 = vor.u32 %v1597_v58, %v1180_v61  ;;  %v1363_v14 = vor.u32 %v1644_v63, %v1362_v62 }
  0x35   :  { %727 = vmatpush.bf16.msrb.mxu0 %v1395_v21  ;;  %v1292_v8 = vld [vmem:[#allocation2 + $0x178] sm:$0xf0]  ;;  %v1657_v9 = vld [vmem:[#allocation2 + $0x274] sm:$0xf]  ;;  %v1426_v12 = vld [vmem:[#allocation2 + $0x280] sm:$0xf]  ;;  %v1111_v15 = vor.u32 %v1579_v1, %v1108_v3 }
  0x36   :  { %778 = vmatpush.bf16.msra.mxu2 %v1215_v18  ;;  %v1420_v10 = vld [vmem:[#allocation2 + $0x278] sm:$0xf0]  ;;  %v1660_v13 = vld [vmem:[#allocation2 + $0x284] sm:$0xf0]  ;;  %v1595_v16 = vld [vmem:[#allocation2 + $0x84] sm:$0xf]  ;;  %v1295_v19 = vor.u32 %v1625_v6, %v1292_v8 }
  0x37   :  { %766 = vmatpush.bf16.msrb.mxu3 %v1143_v22  ;;  %v1172_v17 = vld [vmem:[#allocation2 + $0x88] sm:$0xf0]  ;;  %v1641_v18 = vld [vmem:[#allocation2 + $0x1f4] sm:$0xf]  ;;  %v1423_v20 = vor.u32 %v1657_v9, %v1420_v10  ;;  %v1356_v21 = vld [vmem:[#allocation2 + $0x1f8] sm:$0xf0]  ;;  %v1427_v24 = vor.u32 %v1660_v13, %v1426_v12 }
  0x38   :  { %740 = vmatpush.bf16.msrb.mxu1 %v1459_v29  ;;  %v1673_v22 = vld [vmem:[#allocation2 + $0x2f4] sm:$0xf]  ;;  %v1484_v23 = vld [vmem:[#allocation2 + $0x2f8] sm:$0xf0]  ;;  %v1623_v25 = vld [vmem:[#allocation2 + $0x164] sm:$0xf]  ;;  %v1175_v27 = vor.u32 %v1595_v16, %v1172_v17  ;;  %v1359_v31 = vor.u32 %v1641_v18, %v1356_v21 }
  0x39   :  { %728 = vmatpush.bf16.msrb.mxu0 %v1387_v33  ;;  %1496 = vmatmul.msk.bf16.vlgmr.msrb.gmra.mxu2 %vm669_vm0, %v1832_v45  ;;  %v1284_v26 = vld [vmem:[#allocation2 + $0x168] sm:$0xf0]  ;;  %v1655_v28 = vld [vmem:[#allocation2 + $0x264] sm:$0xf]  ;;  %v1487_v32 = vor.u32 %v1673_v22, %v1484_v23  ;;  %v1621_v40 = vld [vmem:[#allocation2 + $0x154] sm:$0xf] }
  0x3a   :  { %779 = vmatpush.bf16.msra.mxu2 %v1207_v30  ;;  %v1412_v29 = vld [vmem:[#allocation2 + $0x268] sm:$0xf0]  ;;  %v1836_v30 = vld [vmem:[#allocation1 + $0x24] sm:$0xff]  ;;  %v1639_v33 = vld [vmem:[#allocation2 + $0x1e4] sm:$0xf] }
  0x3b   :  { %767 = vmatpush.bf16.msrb.mxu3 %v1135_v34  ;;  %v1287_v34 = vor.u32 %v1623_v25, %v1284_v26  ;;  %v1348_v35 = vld [vmem:[#allocation2 + $0x1e8] sm:$0xf0]  ;;  %v1671_v36 = vld [vmem:[#allocation2 + $0x2e4] sm:$0xf]  ;;  %v1415_v39 = vor.u32 %v1655_v28, %v1412_v29  ;;  %v1404_v43 = vld [vmem:[#allocation2 + $0x258] sm:$0xf0] }
  0x3c   :  { %741 = vmatpush.bf16.msrb.mxu1 %v1451_v41  ;;  %v1476_v37 = vld [vmem:[#allocation2 + $0x2e8] sm:$0xf0]  ;;  %v1276_v41 = vld [vmem:[#allocation2 + $0x158] sm:$0xf0]  ;;  %v1351_v44 = vor.u32 %v1639_v33, %v1348_v35  ;;  %v1669_v50 = vld [vmem:[#allocation2 + $0x2d4] sm:$0xf] }
  0x3d   :  { %729 = vmatpush.bf16.msrb.mxu0 %v1379_v46  ;;  %v1838_v38 = vld [vmem:[#allocation1 + $0x2d] sm:$0xff]  ;;  %v1479_v46 = vor.u32 %v1671_v36, %v1476_v37  ;;  %v1279_v48 = vor.u32 %v1621_v40, %v1276_v41  ;;  %v1340_v49 = vld [vmem:[#allocation2 + $0x1d8] sm:$0xf0]  ;;  %v1617_v3 = vld [vmem:[#allocation2 + $0x134] sm:$0xf] }
  0x3e   :  { %780 = vmatpush.bf16.msra.mxu2 %v1199_v42  ;;  %v1653_v42 = vld [vmem:[#allocation2 + $0x254] sm:$0xf]  ;;  %v1468_v51 = vld [vmem:[#allocation2 + $0x2d8] sm:$0xf0]  ;;  %v1619_v53 = vld [vmem:[#allocation2 + $0x144] sm:$0xf] }
  0x3f   :  { %768 = vmatpush.bf16.msrb.mxu3 %v1127_v47  ;;  %v1637_v47 = vld [vmem:[#allocation2 + $0x1d4] sm:$0xf]  ;;  %v1407_v52 = vor.u32 %v1653_v42, %v1404_v43  ;;  %v1396_v56 = vld [vmem:[#allocation2 + $0x248] sm:$0xf0]  ;;  %v1471_v58 = vor.u32 %v1669_v50, %v1468_v51  ;;  %v1667_v62 = vld [vmem:[#allocation2 + $0x2c4] sm:$0xf] }
  0x40   :  { %742 = vmatpush.bf16.msrb.mxu1 %v1443_v54  ;;  %v1268_v54 = vld [vmem:[#allocation2 + $0x148] sm:$0xf0]  ;;  %v1343_v57 = vor.u32 %v1637_v47, %v1340_v49  ;;  %v1260_v6 = vld [vmem:[#allocation2 + $0x138] sm:$0xf0]  ;;  %v1633_v9 = vld [vmem:[#allocation2 + $0x1b4] sm:$0xf] }
  0x41   :  { %730 = vmatpush.bf16.msrb.mxu0 %v1371_v59  ;;  %v1635_v59 = vld [vmem:[#allocation2 + $0x1c4] sm:$0xf]  ;;  %v1332_v61 = vld [vmem:[#allocation2 + $0x1c8] sm:$0xf0]  ;;  %v1263_v10 = vor.u32 %v1617_v3, %v1260_v6  ;;  %v1665_v12 = vld [vmem:[#allocation2 + $0x2b4] sm:$0xf] }
  0x42   :  { %781 = vmatpush.bf16.msra.mxu2 %v1191_v55  ;;  %v1651_v55 = vld [vmem:[#allocation2 + $0x244] sm:$0xf]  ;;  %v1460_v63 = vld [vmem:[#allocation2 + $0x2c8] sm:$0xf0]  ;;  %v1335_v8 = vor.u32 %v1635_v59, %v1332_v61  ;;  %v1452_v13 = vld [vmem:[#allocation2 + $0x2b8] sm:$0xf0] }
  0x43   :  { %769 = vmatpush.bf16.msrb.mxu3 %v1119_v60  ;;  %v1271_v60 = vor.u32 %v1619_v53, %v1268_v54  ;;  %v1399_v1 = vor.u32 %v1651_v55, %v1396_v56  ;;  %v1252_v16 = vld [vmem:[#allocation2 + $0x128] sm:$0xf0]  ;;  %v1647_v17 = vld [vmem:[#allocation2 + $0x224] sm:$0xf]  ;;  %v1244_v28 = vld [vmem:[#allocation2 + $0x118] sm:$0xf0] }
  0x44   :  { %743 = vmatpush.bf16.msrb.mxu1 %v1435_v7  ;;  %v1649_v7 = vld [vmem:[#allocation2 + $0x234] sm:$0xf]  ;;  %v1380_v18 = vld [vmem:[#allocation2 + $0x228] sm:$0xf0]  ;;  %v1631_v21 = vld [vmem:[#allocation2 + $0x1a4] sm:$0xf] }
  0x45   :  { %731 = vmatpush.bf16.msrb.mxu0 %v1363_v14  ;;  %v1316_v23 = vld [vmem:[#allocation2 + $0x1a8] sm:$0xf0]  ;;  %v1383_v26 = vor.u32 %v1647_v17, %v1380_v18  ;;  %v1645_v29 = vld [vmem:[#allocation2 + $0x214] sm:$0xf]  ;;  %v1308_v36 = vld [vmem:[#allocation2 + $0x198] sm:$0xf0] }
  0x46   :  { %782 = vmatpush.bf16.msra.mxu2 %v1183_v11  ;;  %v1324_v11 = vld [vmem:[#allocation2 + $0x1b8] sm:$0xf0]  ;;  %v1444_v25 = vld [vmem:[#allocation2 + $0x2a8] sm:$0xf0]  ;;  %v1661_v37 = vld [vmem:[#allocation2 + $0x294] sm:$0xf] }
  0x47   :  { %770 = vmatpush.bf16.msrb.mxu3 %v1111_v15  ;;  %v1615_v15 = vld [vmem:[#allocation2 + $0x124] sm:$0xf]  ;;  %v1236_v42 = vld [vmem:[#allocation2 + $0x108] sm:$0xf0]  ;;  %v1684_v59 = vld [vmem:[%s1928_s3 + $0x38] sm:$0xff] }
  0x48   :  { %744 = vmatpush.bf16.msrb.mxu1 %v1427_v24  ;;  %732 = vmatmul.bf16.vlgmr.msrb.gmra.mxu0 %v1836_v30  ;;  %v1255_v22 = vor.u32 %v1615_v15, %v1252_v16  ;;  %v1663_v24 = vld [vmem:[#allocation2 + $0x2a4] sm:$0xf]  ;;  %v1492_v47 = vld [vmem:[#allocation2 + $0x308] sm:$0xf0]  ;;  %v146_v61 = vld [vmem:[%s1927_s2] sm:$0x3] }
  0x49   :  { %789 = vmatpush.bf16.msra.mxu0 %v1295_v19  ;;  %v1327_v19 = vor.u32 %v1633_v9, %v1324_v11  ;;  %v1447_v33 = vor.u32 %v1663_v24, %v1444_v25  ;;  %v1611_v41 = vld [vmem:[#allocation2 + $0x104] sm:$0xf]  ;;  %v1428_v55 = vld [vmem:[#allocation2 + $0x288] sm:$0xf0]  ;;  %v1677_v3 = vld [vmem:[%s1928_s3] sm:$0xff] }
  0x4a   :  { %783 = vmatpush.bf16.msra.mxu2 %v1175_v27  ;;  %771 = vmatmul.bf16.vlgmr.msrb.gmra.mxu3 %v1822_v2  ;;  %v1463_v2 = vor.u32 %v1667_v62, %v1460_v63  ;;  %v1613_v27 = vld [vmem:[#allocation2 + $0x114] sm:$0xf]  ;;  %v1643_v43 = vld [vmem:[#allocation2 + $0x204] sm:$0xf]  ;;  %v1239_v50 = vor.u32 %v1611_v41, %v1236_v42 }
  0x4b   :  { %815 = vmatpush.bf16.msra.mxu3 %v1423_v20  ;;  %745 = vmatmul.bf16.vlgmr.msrb.gmra.mxu1 %v1838_v38  ;;  %v1455_v20 = vor.u32 %v1665_v12, %v1452_v13  ;;  %v1247_v35 = vor.u32 %v1613_v27, %v1244_v28  ;;  %v1627_v51 = vld [vmem:[#allocation2 + $0x184] sm:$0xf]  ;;  %v1691_v12 = vld [vmem:[%s1928_s3 + $0x70] sm:$0xff] }
  0x4c   :  { %802 = vmatpush.bf16.msra.mxu1 %v1359_v31  ;;  %v1372_v31 = vld [vmem:[#allocation2 + $0x218] sm:$0xf0]  ;;  %v1659_v54 = vld [vmem:[#allocation2 + $0x284] sm:$0xf] }
  0x4d   :  { %790 = vmatpush.bf16.msra.mxu0 %v1287_v34  ;;  %784 = vmatmul.bf16.vlgmr.msra.gmra.mxu2 %v1827_v5  ;;  %v1388_v5 = vld [vmem:[#allocation2 + $0x238] sm:$0xf0]  ;;  %v1629_v34 = vld [vmem:[#allocation2 + $0x194] sm:$0xf]  ;;  %v1375_v40 = vor.u32 %v1645_v29, %v1372_v31  ;;  %v1690_v18 = vld [vmem:[%s1928_s3 + $0x68] sm:$0xff] }
  0x4e   :  { %828 = vmatpush.bf16.msrb.mxu2 %v1487_v32  ;;  %v1391_v14 = vor.u32 %v1649_v7, %v1388_v5  ;;  %v1319_v32 = vor.u32 %v1631_v21, %v1316_v23  ;;  %v1689_v21 = vld [vmem:[%s1928_s3 + $0x60] sm:$0xff]  ;;  %v1687_v31 = vld [vmem:[%s1928_s3 + $0x50] sm:$0xff] }
  0x4f   :  { %816 = vmatpush.bf16.msra.mxu3 %v1415_v39  ;;  %v1436_v39 = vld [vmem:[#allocation2 + $0x298] sm:$0xf0] }
  0x50   :  { %803 = vmatpush.bf16.msra.mxu1 %v1351_v44  ;;  %v1364_v44 = vld [vmem:[#allocation2 + $0x208] sm:$0xf0]  ;;  %v1439_v49 = vor.u32 %v1661_v37, %v1436_v39  ;;  %v1685_v37 = vld [vmem:[%s1928_s3 + $0x40] sm:$0xff] }
  0x51   :  { %791 = vmatpush.bf16.msra.mxu0 %v1279_v48  ;;  %v1311_v48 = vor.u32 %v1629_v34, %v1308_v36  ;;  %v1367_v53 = vor.u32 %v1643_v43, %v1364_v44  ;;  %v1686_v36 = vld [vmem:[%s1928_s3 + $0x48] sm:$0xff] }
  0x52   :  { %829 = vmatpush.bf16.msrb.mxu2 %v1479_v46  ;;  %v1675_v46 = vld [vmem:[#allocation2 + $0x304] sm:$0xf] }
  0x53   :  { %817 = vmatpush.bf16.msra.mxu3 %v1407_v52  ;;  %v1300_v52 = vld [vmem:[#allocation2 + $0x188] sm:$0xf0]  ;;  %v1495_v56 = vor.u32 %v1675_v46, %v1492_v47 }
  0x54   :  { %804 = vmatpush.bf16.msra.mxu1 %v1343_v57  ;;  %v1303_v57 = vor.u32 %v1627_v51, %v1300_v52 }
  0x55   :  { %792 = vmatpush.bf16.msra.mxu0 %v1271_v60  ;;  %v1683_v60 = vld [vmem:[%s1928_s3 + $0x30] sm:$0xff] }
  0x56   :  { %830 = vmatpush.bf16.msrb.mxu2 %v1471_v58  ;;  %v1431_v58 = vor.u32 %v1659_v54, %v1428_v55 }
  0x57   :  { %818 = vmatpush.bf16.msra.mxu3 %v1399_v1  ;;  %v147_v1 = vunpack.c.l.bf16 %v146_v61 }
  0x58   :  { %805 = vmatpush.bf16.msra.mxu1 %v1335_v8 }
  0x59   :  { %793 = vmatpush.bf16.msra.mxu0 %v1263_v10  ;;  %v149_v7 = vperm.slane %v147_v1, 0 }
  0x5a   :  { %831 = vmatpush.bf16.msrb.mxu2 %v1463_v2  ;;  %v1692_v2 = vld [vmem:[%s1928_s3 + $0x78] sm:$0xff] }
  0x5b   :  { %819 = vmatpush.bf16.msra.mxu3 %v1391_v14  ;;  %v153_v10 = vperm.slane %v149_v7, 0 }
  0x5c   :  { %806 = vmatpush.bf16.msra.mxu1 %v1327_v19 }
  0x5d   :  { %794 = vmatpush.bf16.msra.mxu0 %v1255_v22 }
  0x5e   :  { %832 = vmatpush.bf16.msrb.mxu2 %v1455_v20 }
  0x5f   :  { %820 = vmatpush.bf16.msra.mxu3 %v1383_v26  ;;  %v1688_v26 = vld [vmem:[%s1928_s3 + $0x58] sm:$0xff] }
  0x60   :  { %807 = vmatpush.bf16.msra.mxu1 %v1319_v32 }
  0x61   :  { %795 = vmatpush.bf16.msra.mxu0 %v1247_v35 }
  0x62   :  { %833 = vmatpush.bf16.msrb.mxu2 %v1447_v33 }
  0x63   :  { %821 = vmatpush.bf16.msra.mxu3 %v1375_v40  ;;  %v150_v40 = vperm.slane %v147_v1, 2  ;;  %v890_v1 = vld [vmem:[%s1929_s4] sm:$0x1] }
  0x64   :  { %808 = vmatpush.bf16.msra.mxu1 %v1311_v48 }
  0x65   :  { %796 = vmatpush.bf16.msra.mxu0 %v1239_v50  ;;  %v154_v42 = vperm.slane %v150_v40, 0 }
  0x66   :  { %834 = vmatpush.bf16.msrb.mxu2 %v1439_v49 }
  0x67   :  { %822 = vmatpush.bf16.msra.mxu3 %v1367_v53 }
  0x68   :  { %809 = vmatpush.bf16.msra.mxu1 %v1303_v57  ;;  %797 = vmatmul.bf16.vlgmr.msra.gmra.mxu0 %v1820_v0  ;;  %v1682_v0 = vld [vmem:[%s1928_s3 + $0x28] sm:$0xff] }
  0x69   :  { %848 = vmatpush.bf16.msrb.mxu0 %v1495_v56 }
  0x6a   :  { %823 = vmatmul.bf16.vlgmr.msra.gmra.mxu3 %v1836_v30  ;;  %835 = vmatpush.bf16.msrb.mxu2 %v1431_v58  ;;  %v1679_v30 = vld [vmem:[%s1928_s3 + $0x10] sm:$0xff] }
  0x6b   :  { %810 = vmatmul.bf16.vlgmr.msra.gmra.mxu1 %v1825_v4  ;;  %v1681_v4 = vld [vmem:[%s1928_s3 + $0x20] sm:$0xff]  ;;  %1002 = vmatpush.bf16.msrb.mxu3 %v1692_v2 }
  0x6c   :  { %989 = vmatpush.bf16.msrb.mxu1 %v1684_v59 }
  0x6d   :  { %836 = vmatmul.bf16.vlgmr.msrb.gmra.mxu2 %v1838_v38  ;;  %v1678_v38 = vld [vmem:[%s1928_s3 + $0x8] sm:$0xff] }
  0x6f   :  { %1003 = vmatpush.bf16.msrb.mxu3 %v1691_v12 }
  0x70   :  { %990 = vmatpush.bf16.msrb.mxu1 %v1683_v60 }
  0x73   :  { %1004 = vmatpush.bf16.msrb.mxu3 %v1690_v18 }
  0x74   :  { %991 = vmatpush.bf16.msrb.mxu1 %v1682_v0 }
  0x77   :  { %1005 = vmatpush.bf16.msrb.mxu3 %v1689_v21 }
  0x78   :  { %1497 = vmatmul.msk.bf16.vlgmr.msrb.gmra.mxu0 %vm669_vm0, %v1832_v45  ;;  %992 = vmatpush.bf16.msrb.mxu1 %v1681_v4  ;;  %v1680_v45 = vld [vmem:[%s1928_s3 + $0x18] sm:$0xff] }
  0x7b   :  { %1006 = vmatpush.bf16.msrb.mxu3 %v1688_v26 }
  0x7c   :  { %993 = vmatpush.bf16.msrb.mxu1 %v1680_v45  ;;  %v1696_v45 = vld [vmem:[%s1930_s5 + $0x18] sm:$0xff] }
  0x7d   :  { %1060 = vmatpush.bf16.msra.mxu0 %v1696_v45 }
  0x7f   :  { %1007 = vmatpush.bf16.msrb.mxu3 %v1687_v31 }
  0x80   :  { %994 = vmatpush.bf16.msrb.mxu1 %v1679_v30  ;;  %v1695_v30 = vld [vmem:[%s1930_s5 + $0x10] sm:$0xff] }
  0x81   :  { %1061 = vmatpush.bf16.msra.mxu0 %v1695_v30 }
  0x83   :  { %1008 = vmatpush.bf16.msrb.mxu3 %v1686_v36 }
  0x84   :  { %995 = vmatpush.bf16.msrb.mxu1 %v1678_v38  ;;  %v1694_v38 = vld [vmem:[%s1930_s5 + $0x8] sm:$0xff] }
  0x85   :  { %1062 = vmatpush.bf16.msra.mxu0 %v1694_v38 }
  0x87   :  { %1009 = vmatpush.bf16.msrb.mxu3 %v1685_v37 }
  0x88   :  { %996 = vmatpush.bf16.msrb.mxu1 %v1677_v3  ;;  %v891_v3 = vunpack.c.l.bf16 %v890_v1 }
  0xa5   :  { %v681_v62 = vpop.f32.mrf.mxu0 }
  0xa6   :  { %v682_v13 = vadd.f32 %v681_v62, %v153_v10 }
  0xa8   :  { %v694_v63 = vpop.f32.mrf.mxu1 }
  0xa9   :  { %v695_v15 = vadd.f32 %v694_v63, %v682_v13  ;;  %v1693_v63 = vld [vmem:[%s1930_s5] sm:$0xff] }
  0xaa   :  { %1063 = vmatpush.bf16.msra.mxu0 %v1693_v63 }
  0xac   :  { %v707_v6 = vpop.f32.mrf.mxu2 }
  0xad   :  { %v720_v5 = vpop.f32.mrf.mxu3  ;;  %v683_v8 = vpop.f32.mrf.mxu0  ;;  %v708_v17 = vadd.f32 %v707_v6, %v695_v15  ;;  %v892_v6 = vperm.slane %v891_v3, 0 }
  0xaf   :  { %v721_v19 = vadd.f32 %v720_v5, %v708_v17 }
  0xb0   :  { %v696_v9 = vpop.f32.mrf.mxu1 }
  0xb4   :  { %v709_v11 = vpop.f32.mrf.mxu2 }
  0xb5   :  { %v722_v14 = vpop.f32.mrf.mxu3  ;;  %v1025_v11 = vld [vmem:[%s1931_s6] sm:$0x1] }
  0xb6   :  { %v1026_v12 = vunpack.c.l.bf16 %v1025_v11 }
  0xb8   :  { %v1027_v13 = vperm.slane %v1026_v12, 0 }
  0xbc   :  { %v759_v16 = vpop.f32.mrf.mxu2 }
  0xc4   :  { %v761_v23 = vpop.f32.mrf.mxu2 }
  0xc5   :  { %v733_v20 = vpop.f32.mrf.mxu0 }
  0xc6   :  { %v734_v22 = vadd.f32 %v733_v20, %v721_v19 }
  0xc8   :  { %v746_v24 = vpop.f32.mrf.mxu1 }
  0xc9   :  { %v747_v25 = vadd.f32 %v746_v24, %v734_v22 }
  0xcb   :  { %v760_v27 = vadd.f32 %v759_v16, %v747_v25 }
  0xcd   :  { %v854_v28 = vmax.f32 %v760_v27, 0.0  ;;  %v735_v29 = vpop.f32.mrf.mxu0  ;;  %v772_v34 = vpop.f32.mrf.mxu3 }
  0xce   :  { %v773_v43 = vadd.f32 %v772_v34, %v154_v42 }
  0xcf   :  { %v856_v32 = vpack.c.bf16 %v854_v28, %v854_v28 }
  0xd0   :  { %v785_v33 = vpop.f32.mrf.mxu2  ;;  %v748_v35 = vpop.f32.mrf.mxu1 }
  0xd1   :  { %997 = vmatmul.bf16.vlgmr.msrb.gmra.mxu1 %v856_v32  ;;  %v786_v46 = vadd.f32 %v785_v33, %v773_v43 }
  0xd5   :  { %v774_v41 = vpop.f32.mrf.mxu3 }
  0xd8   :  { %v787_v39 = vpop.f32.mrf.mxu2 }
  0xe5   :  { %v798_v44 = vpop.f32.mrf.mxu0 }
  0xe6   :  { %v799_v48 = vadd.f32 %v798_v44, %v786_v46 }
  0xe8   :  { %v811_v47 = vpop.f32.mrf.mxu1 }
  0xe9   :  { %v812_v51 = vadd.f32 %v811_v47, %v799_v48 }
  0xed   :  { %v824_v49 = vpop.f32.mrf.mxu3  ;;  %v800_v50 = vpop.f32.mrf.mxu0 }
  0xee   :  { %v825_v53 = vadd.f32 %v824_v49, %v812_v51 }
  0xf0   :  { %v837_v52 = vpop.f32.mrf.mxu2  ;;  %v813_v54 = vpop.f32.mrf.mxu1 }
  0xf1   :  { %v838_v55 = vadd.f32 %v837_v52, %v825_v53 }
  0xf5   :  { %v826_v56 = vpop.f32.mrf.mxu3  ;;  %v850_v57 = vpop.f32.mrf.mxu0 }
  0xf6   :  { %v851_v58 = vadd.f32 %v850_v57, %v838_v55 }
  0xf8   :  { %v839_v59 = vpop.f32.mrf.mxu2  ;;  %v855_v60 = vmax.f32 %v851_v58, 0.0 }
  0xfa   :  { %v857_v0 = vpack.c.bf16 %v855_v60, %v855_v60 }
  0xfc   :  { %1010 = vmatmul.bf16.vlgmr.msrb.gmra.mxu3 %v857_v0 }
  0xfd   :  { %v852_v4 = vpop.f32.mrf.mxu0 }
 0x14e   :  { %v998_v61 = vpop.f32.mrf.mxu1 }
 0x14f   :  { %v999_v7 = vadd.f32 %v998_v61, %v892_v6 }
 0x156   :  { %v1000_v62 = vpop.f32.mrf.mxu1 }
 0x17f   :  { %v1011_v5 = vpop.f32.mrf.mxu3 }
 0x180   :  { %v1012_v8 = vadd.f32 %v1011_v5, %v999_v7 }
 0x182   :  { %v1015_v2 = vmax.f32 %v1012_v8, 0.0 }
 0x184   :  { %v1016_v9 = vpack.c.bf16 %v1015_v2, %v1015_v2 }
 0x186   :  { %1578 = vmatmul.msk.bf16.vlgmr.msra.gmra.mxu0 %vm1052_vm1, %v1016_v9 }
 0x187   :  { %v1013_v10 = vpop.f32.mrf.mxu3 }
 0x203   :  { %v1065_v14 = vpop.f32.mrf.mxu0 }
 0x204   :  { %v1066_v15 = vadd.f32 %v1065_v14, %v1027_v13 }
 0x206   :  { %v1069_v16 = vmax.f32 %v1066_v15, 0.0 }
 0x208   :  { %v1071_v17 = vsel %vm1070_vm2, %v1069_v16, -inf }
 0x209   :  { %1072 = vmax.xlane.f32.xlu0 %v1071_v17 }
 0x20b   :  { %v1067_v18 = vpop.f32.mrf.mxu0 }
 0x27c   :  { %v1073_v19 = vpop.xlane.xlu0 %1072 }
 0x27d   :  { %v1074_v20 = vsub.f32 %v1069_v16, %v1073_v19 }
 0x27f   :  { %v1075_v21 = vmul.f32 1.442695, %v1074_v20 }
 0x281   :  { %1703 = vpow2.f32 %v1075_v21 }
 0x287   :  { %v1704_v22 = vpop.eup %1703 }
 0x288   :  { %v1077_v23 = vsel %vm1070_vm2, %v1704_v22, 0.0 }
 0x289   :  { %1078 = vadd.xlane.f32.xlu0 %v1077_v23 }
 0x2fc   :  { %v1079_v24 = vpop.xlane.xlu0 %1078 }
 0x2fd   :  { %1705 = vlog2.f32 %v1079_v24 }
 0x303   :  { %v1706_v25 = vpop.eup %1705 }
 0x304   :  { %v1081_v26 = vmul.f32 0.6931472, %v1706_v25 }
 0x306   :  { %v1082_v27 = vadd.f32 %v1081_v26, %v1073_v19 }
 0x308   :  { %v1083_v28 = vsub.f32 %v1069_v16, %v1082_v27 }
 0x30a   :  { %1084 = vst.msk [vmem:[#allocation5] sm:$0xff] %vm1070_vm2, %v1083_v28 }
 0x30b   :  { %1088 = vsyncadd [#allocation4], 96  ;;  %s1091_s6 = sshll.u32 %s1932_s7, 4  ;;  %s1762_s9 = smov [#allocation5]   ;;  %s1092_s6 = int_to_ptr.hbm [resolvable:$true] %s1091_s6 }
 0x30c   :  { %s1089_s2 = sshll.u32 %s1762_s9, 4  ;;  %s1763_s10 = smov 32   ;;  %s1090_s2 = int_to_ptr.vmem [resolvable:$true] %s1089_s2 }
 0x30d   :  { %s1764_s11 = smov 2  }
 0x30e   :  { %1097 = dma.vmem_to_hbm [thread:$0]  %s1090_s2, 32, %s1092_s6, [#allocation4], %s1763_s10, %s1763_s10, %s1764_s11  }
 0x30f   :  { %1757 = dma.done.wait [#allocation4], 128  }
 0x310   :  { %1758 = vsyncadd [#allocation4], 4294967168 }
 0x311   :  { %1102 = vsyncpa [#allocation3], 1 }
 0x312   :  { %1103 = vsyncpa [#allocation4], 1 }

</bundles_post_ra>
